<compile_context>
chip_gen: v7x
topology: tpu7x:2x2x1
jax: 0.10.0
libtpu: 0.0.40
codegen_flags: <defaults>
</compile_context>

<pallas_src>
import jax
import jax.numpy as jnp
from jax import lax
from jax.experimental import pallas as pl
from jax.experimental.pallas import tpu as pltpu


_MAX_HW_TILE = 2048        # lanes per HW tile when HW must be tiled (multiple of 128)
_VECTOR_HW_MAX = 8         # HW <= this -> vector path (C_in on the lane axis)
_TARGET_GRID_STEPS = 8     # >= ~4 steps per TensorCore on v7x


def _vmem_capacity_bytes():
    try:
        cap = getattr(pltpu.get_tpu_info(), "vmem_capacity_bytes", None)
        if cap:
            return int(cap)
    except Exception:
        pass
    return 64 * 1024 * 1024   # conservative (v7x-sized) fallback


def _vmem_budget_and_limit():
    cap = _vmem_capacity_bytes()
    # Double-buffered working-set budget, generation dependent.
    if cap <= 64 * 1024 * 1024:        # v7x-class: 64 MiB per TensorCore
        budget = 24 * 1024 * 1024
    else:                              # v5e / v6e: 128 MiB
        budget = 48 * 1024 * 1024
    limit = int(min(cap, 2 * budget))
    return budget, limit


def _choose_batch_tile(b, per_elem_bytes, budget, hw_steps):
    """Largest divisor-of-B batch tile that fits VMEM and still yields >= ~8 grid steps."""
    max_bt = max(1, int(budget // max(1, per_elem_bytes)))
    want_batch_steps = max(1, -(-_TARGET_GRID_STEPS // hw_steps))   # ceil
    bt = max(1, min(b, max_bt, -(-b // want_batch_steps)))          # ceil(b / steps)
    while b % bt:
        bt -= 1
    return bt


def _matrix_kernel(x_ref, w_ref, b_ref, o_ref):
    # x: (BT, C_in, THW)  w: (BT, C_out, C_in)  b: (BT, C_out, 1)  o: (BT, C_out, THW)
    acc = lax.dot_general(
        w_ref[...], x_ref[...],
        dimension_numbers=(((2,), (1,)), ((0,), (0,))),
        preferred_element_type=jnp.float32)
    acc = acc + b_ref[...].astype(jnp.float32)
    o_ref[...] = acc.astype(o_ref.dtype)


def _vector_kernel(x_ref, w_ref, b_ref, o_ref):
    # x: (BT, HW, C_in)  w: (BT, C_out, C_in)  b: (BT, 1, C_out)  o: (BT, HW, C_out)
    acc = lax.dot_general(
        x_ref[...], w_ref[...],
        dimension_numbers=(((2,), (2,)), ((0,), (0,))),
        preferred_element_type=jnp.float32)
    acc = acc + b_ref[...].astype(jnp.float32)
    o_ref[...] = acc.astype(o_ref.dtype)


def target_fc(x, weight, bias):
    """
    x:      (B, C_in, H, W)        -- NCHW, like the PyTorch module input
    weight: (B, C_out, C_in, 1, 1) -- per-image FC weights (1x1 conv kernels)
    bias:   (B, C_out)             -- per-image biases
    returns (B, C_out, H, W)
    """
    B, C_in, H, W = x.shape
    C_out = weight.shape[1]
    HW = H * W

    x_item = jnp.dtype(x.dtype).itemsize
    w_item = jnp.dtype(weight.dtype).itemsize
    b_item = jnp.dtype(bias.dtype).itemsize
    budget, vmem_limit = _vmem_budget_and_limit()

    flops = 2 * B * C_out * C_in * HW
    bytes_accessed = (B * C_in * HW * x_item + B * C_out * C_in * w_item
                      + B * C_out * b_item + B * C_out * HW * x_item)
    cost = pl.CostEstimate(flops=flops, transcendentals=0,
                           bytes_accessed=bytes_accessed)

    w_flat = weight.reshape(B, C_out, C_in).astype(x.dtype)

    if HW <= _VECTOR_HW_MAX:
        # ---- vector path: C_in on lanes, batched matvec (no lane padding) ----
        if HW == 1:
            x_t = x.reshape(B, 1, C_in)                      # pure reshape, no data movement
        else:
            x_t = x.reshape(B, C_in, HW).transpose(0, 2, 1)  # tiny (HW <= 8)
        b_t = bias.reshape(B, 1, C_out)

        per_elem = (2 * (HW * C_in * x_item + C_out * C_in * w_item
                         + C_out * b_item + HW * C_out * x_item)
                    + HW * C_out * 4)                        # f32 accumulator
        BT = _choose_batch_tile(B, per_elem, budget, 1)

        out = pl.pallas_call(
            _vector_kernel,
            out_shape=jax.ShapeDtypeStruct((B, HW, C_out), x.dtype),
            grid_spec=pltpu.PrefetchScalarGridSpec(
                num_scalar_prefetch=0,
                grid=(B // BT,),
                in_specs=[
                    pl.BlockSpec((BT, HW, C_in), lambda b: (b, 0, 0)),
                    pl.BlockSpec((BT, C_out, C_in), lambda b: (b, 0, 0)),
                    pl.BlockSpec((BT, 1, C_out), lambda b: (b, 0, 0)),
                ],
                out_specs=pl.BlockSpec((BT, HW, C_out), lambda b: (b, 0, 0)),
            ),
            compiler_params=pltpu.CompilerParams(
                dimension_semantics=("parallel",),
                vmem_limit_bytes=vmem_limit),
            cost_estimate=cost,
        )(x_t, w_flat, b_t)

        if HW == 1:
            return out.reshape(B, C_out, H, W)               # pure reshape
        return out.transpose(0, 2, 1).reshape(B, C_out, H, W)

    # ---- matrix path: HW flattened onto lanes, no padding ----
    x_flat = x.reshape(B, C_in, HW)
    b_flat = bias.reshape(B, C_out, 1)

    if HW <= _MAX_HW_TILE:
        THW = HW                      # full extent -> legal block regardless of divisibility
        hw_steps = 1
    else:
        THW = _MAX_HW_TILE            # multiple of 128; last block may be partial
        hw_steps = pl.cdiv(HW, THW)

    per_elem = (2 * (C_in * THW * x_item + C_out * C_in * w_item
                     + C_out * b_item + C_out * THW * x_item)
                + C_out * THW * 4)    # f32 accumulator
    BT = _choose_batch_tile(B, per_elem, budget, hw_steps)

    out = pl.pallas_call(
        _matrix_kernel,
        out_shape=jax.ShapeDtypeStruct((B, C_out, HW), x.dtype),
        grid_spec=pltpu.PrefetchScalarGridSpec(
            num_scalar_prefetch=0,
            grid=(B // BT, hw_steps),
            in_specs=[
                pl.BlockSpec((BT, C_in, THW), lambda b, h: (b, 0, h)),
                # weight/bias block indices are constant along the HW axis,
                # so they stay VMEM-resident across HW tiles (no re-DMA).
                pl.BlockSpec((BT, C_out, C_in), lambda b, h: (b, 0, 0)),
                pl.BlockSpec((BT, C_out, 1), lambda b, h: (b, 0, 0)),
            ],
            out_specs=pl.BlockSpec((BT, C_out, THW), lambda b, h: (b, 0, h)),
        ),
        compiler_params=pltpu.CompilerParams(
            dimension_semantics=("parallel", "parallel"),
            vmem_limit_bytes=vmem_limit),
        cost_estimate=cost,
    )(x_flat, w_flat, b_flat)

    return out.reshape(B, C_out, H, W)


if __name__ == "__main__":
    key = jax.random.PRNGKey(0)

    def ref_target_fc(x, weight, bias):
        return (jnp.einsum("boc,bchw->bohw", weight[:, :, :, 0, 0], x,
                           precision=lax.Precision.HIGHEST)
                + bias[:, :, None, None])

    # Case 1: spatial feature map (matrix path).
    B, C_in, C_out, H, W = 2, 32, 16, 16, 16
    k1, k2, k3, k4, k5, k6 = jax.random.split(key, 6)
    x1 = jax.random.normal(k1, (B, C_in, H, W), dtype=jnp.float32)
    w1 = jax.random.normal(k2, (B, C_out, C_in, 1, 1), dtype=jnp.float32) * 0.1
    b1 = jax.random.normal(k3, (B, C_out), dtype=jnp.float32) * 0.1
    o1 = jax.block_until_ready(target_fc(x1, w1, b1))
    assert o1.shape == (B, C_out, H, W)
    assert jnp.allclose(o1, ref_target_fc(x1, w1, b1), atol=1e-4, rtol=1e-4)

    # Case 2: per-image FC on a pooled vector (HW == 1, vector path) --
    # the layout the real hyperIQA TargetFC layers actually use.
    B2, Ci2, Co2 = 2, 64, 32
    x2 = jax.random.normal(k4, (B2, Ci2, 1, 1), dtype=jnp.float32)
    w2 = jax.random.normal(k5, (B2, Co2, Ci2, 1, 1), dtype=jnp.float32) * 0.1
    b2 = jax.random.normal(k6, (B2, Co2), dtype=jnp.float32) * 0.1
    o2 = jax.block_until_ready(target_fc(x2, w2, b2))
    assert o2.shape == (B2, Co2, 1, 1)
    assert jnp.allclose(o2, ref_target_fc(x2, w2, b2), atol=1e-4, rtol=1e-4)

    print("KERNEL_OK")
</pallas_src>

<mosaic_0001>
module attributes {stable_mosaic.version = 11 : i64} {
  func.func @_matrix_kernel(%arg0: i32, %arg1: i32, %arg2: memref<1x32x256xf32, #tpu.memory_space<vmem>>, %arg3: memref<1x16x32xf32, #tpu.memory_space<vmem>>, %arg4: memref<1x16x1xf32, #tpu.memory_space<vmem>>, %arg5: memref<1x16x256xf32, #tpu.memory_space<vmem>>) attributes {dimension_semantics = [#tpu.dimension_semantics<parallel>, #tpu.dimension_semantics<parallel>], iteration_bounds = array<i64: 2, 1>, scalar_prefetch = 0 : i64, scratch_operands = 0 : i64, tpu.core_type = #tpu.core_type<tc>, window_params = [{transform_indices = @transform_0, window_bounds = array<i64: 1, 32, 256>}, {transform_indices = @transform_1, window_bounds = array<i64: 1, 16, 32>}, {transform_indices = @transform_2, window_bounds = array<i64: 1, 16, 1>}, {transform_indices = @transform_3, window_bounds = array<i64: 1, 16, 256>}]} {
    %c0 = arith.constant 0 : index
    %c0_0 = arith.constant 0 : index
    %c0_1 = arith.constant 0 : index
    %0 = vector.load %arg3[%c0, %c0_0, %c0_1] : memref<1x16x32xf32, #tpu.memory_space<vmem>>, vector<1x16x32xf32>
    %c0_2 = arith.constant 0 : index
    %c0_3 = arith.constant 0 : index
    %c0_4 = arith.constant 0 : index
    %1 = vector.load %arg2[%c0_2, %c0_3, %c0_4] : memref<1x32x256xf32, #tpu.memory_space<vmem>>, vector<1x32x256xf32>
    %cst = arith.constant dense<0.000000e+00> : vector<1x16x256xf32>
    %2 = tpu.matmul %0, %1, %cst {dimension_numbers = #tpu.dot_dimension_numbers<[2], [1], [1], [2], [0, 0, 0, 1, 1, 2], [0], [0]>} : vector<1x16x32xf32>, vector<1x32x256xf32>, vector<1x16x256xf32> -> vector<1x16x256xf32>
    %c0_5 = arith.constant 0 : index
    %c0_6 = arith.constant 0 : index
    %c0_7 = arith.constant 0 : index
    %3 = vector.load %arg4[%c0_5, %c0_6, %c0_7] : memref<1x16x1xf32, #tpu.memory_space<vmem>>, vector<1x16x1xf32>
    %4 = vector.broadcast %3 : vector<1x16x1xf32> to vector<1x16x256xf32>
    %5 = arith.addf %2, %4 : vector<1x16x256xf32>
    %c0_8 = arith.constant 0 : index
    %c0_9 = arith.constant 0 : index
    %c0_10 = arith.constant 0 : index
    %6 = vector.load %arg5[%c0_8, %c0_9, %c0_10] : memref<1x16x256xf32, #tpu.memory_space<vmem>>, vector<1x16x256xf32>
    tpu.vector_store %arg5[%c0_8, %c0_9, %c0_10], %5 {strides = array<i32>} : memref<1x16x256xf32, #tpu.memory_space<vmem>>, vector<1x16x256xf32>,
    return
  }
  func.func @transform_0(%arg0: i32, %arg1: i32) -> (i32, i32, i32) {
    %c0_i32 = arith.constant 0 : i32
    %c0_i32_0 = arith.constant 0 : i32
    return %arg0, %c0_i32, %arg1 : i32, i32, i32
  }
  func.func @transform_1(%arg0: i32, %arg1: i32) -> (i32, i32, i32) {
    %c0_i32 = arith.constant 0 : i32
    %c0_i32_0 = arith.constant 0 : i32
    %c0_i32_1 = arith.constant 0 : i32
    return %arg0, %c0_i32, %c0_i32_0 : i32, i32, i32
  }
  func.func @transform_2(%arg0: i32, %arg1: i32) -> (i32, i32, i32) {
    %c0_i32 = arith.constant 0 : i32
    %c0_i32_0 = arith.constant 0 : i32
    %c0_i32_1 = arith.constant 0 : i32
    return %arg0, %c0_i32, %c0_i32_0 : i32, i32, i32
  }
  func.func @transform_3(%arg0: i32, %arg1: i32) -> (i32, i32, i32) {
    %c0_i32 = arith.constant 0 : i32
    %c0_i32_0 = arith.constant 0 : i32
    return %arg0, %c0_i32, %arg1 : i32, i32, i32
  }
}

</mosaic_0001>

<bundles_post_ra>
// kernel: tpu_custom_call.1
= control target key start
LH: loop header
LB: loop body
LE: loop exit
PB: predicated region body
PF: predicated region fallthrough
CT: control target
= control target key end

     0   :  { %8 = vsyncpa [#allocation3], 0  ;;  %s918_s0 = inlined_call_operand.hbm [shape: f32[2,32,256], index: 0, kind: input, shape index: {}]   ;;  %s919_s1 = inlined_call_operand.vmem [shape: f32[2,16,32], index: 1, kind: input, shape index: {}]   ;;  %s920_s2 = inlined_call_operand.vmem [shape: f32[2,16,1], index: 2, kind: input, shape index: {}]   ;;  %s921_s3 = inlined_call_operand.hbm [shape: f32[2,16,256], index: 3, kind: output, shape index: {}]  }
   0x1   :  { %10 = vsyncpa [#allocation3 + $0x1], 0 }
   0x2   :  { %11 = vsyncpa [#allocation4], 0 }
   0x3   :  { %13 = vsyncpa [#allocation4 + $0x1], 0  ;;  %s734_s12 = smov 0   ;;  %s736_s13 = smov 0  }
   0x4   :  { %s738_s14 = smov 0   ;;  %s740_s15 = smov 0  }
   0x5   :  { %s742_s16 = smov 0   ;;  %s744_s17 = smov 0  }
   0x6 LB: > { %s486_s18 = sadd.s32 4294967295, %s704_s17   ;;  %s487_s19 = sadd.s32 4294967294, %s704_s17   ;;  %s704_s17 = sphi %s744_s17, %s19_s17   ;;  %s700_s16 = sphi %s742_s16, %s936_s16   ;;  %s696_s15 = sphi %s740_s15, %s935_s15   ;;  %s692_s14 = sphi %s738_s14, %s934_s14   ;;  %s688_s13 = sphi %s736_s13, %s933_s13   ;;  %s684_s12 = sphi %s734_s12, %s932_s12  }
   0x7   : > { %s31_s20 = sadd.s32 1, %s700_s16  ;;  %s40_s21 = sadd.s32 1, %s692_s14 }
   0x8   : > { %p33_p0 = scmp.ge.s32.totalorder %s31_s20, 2  ;;  %p47_p1 = scmp.ne.s32.totalorder %s692_s14, %s688_s13 }
   0x9   : > { %p48_p2 = scmp.eq.s32.totalorder %s704_s17, 0  ;;  %p53_p3 = scmp.ne.s32.totalorder %s688_s13, %s684_s12 }
   0xa   : > { %s938_s20 = smov (%p33_p0, %s31_s20), 0  ;;  %p54_p5 = scmp.eq.s32.totalorder %s486_s18, 0 }
   0xb   : > { %p775_p4 = por %p48_p2, %p47_p1  ;;  %s35_s23 = ssub.s32 %s700_s16, %s938_s20 }
   0xc   : > { %p131_p6 = scmp.eq.s32.totalorder %s486_s18, 1  ;;  %p38_p7 = scmp.eq.s32.totalorder %s35_s23, 0 }
   0xd   : > { %p781_p8 = por %p54_p5, %p53_p3  ;;  %p137_p10 = scmp.eq.s32.totalorder %s487_s19, 1 }
   0xe   : > { %p785_p9 = por %p131_p6, %p47_p1  ;;  %p535_p13 = scmp.lt.s32.totalorder %s704_s17, 2 }
   0xf   : > { %s790_s26 = scalar_select %p38_p7, %s692_s14, %s40_s21  }
  0x10   : > { %s925_s25 = scalar_select %p785_p9, 1, 0 }
  0x11   : > { %p792_p11 = por %p137_p10, %p53_p3  ;;  %s157_s28 = sand.u32 1, %s692_s14  }
  0x12   : > { %s490_s29 = sshll.u32 %s157_s28, 6  ;;  %s507_s30 = sshll.u32 %s700_s16, 10 }
  0x13   : > { %s926_s27 = scalar_select %p792_p11, 1, 0 }
  0x14   : > { %s803_s6 = scalar_lea.hbm %s918_s0, %s507_s30  ;;  %s161_s7 = scalar_lea.vmem [#allocation2], %s490_s29 }
  0x15   : > { %s170_s8 = sshll.u32 %s161_s7, 4  ;;  %p809_p0 = pnand %p535_p13, %p775_p4  ;;  %s805_s8 = int_to_ptr.vmem [resolvable:$true] %s170_s8 }
  0x16   : > { %s814_s10 = scalar_lea.sflag [#allocation3], %s157_s28  ;;  %s592_s11 = scalar_lea.hbm %s803_s6, 1024 }
  0x17   : > { %p593_p2 = scmp.ne.s32.totalorder %s803_s6, %s592_s11  ;;  %p594_p3 = pneg %p809_p0 }
  0x18   : > { %s597_s21 = scalar_lea.hbm %s918_s0, 2048  ;;  %p598_p4 = scmp.lt.u32.totalorder %s803_s6, %s918_s0 }
  0x19   : > { %p595_p5 = pnand %p594_p3, %p593_p2  ;;  %p599_p7 = scmp.lt.u32.totalorder %s597_s21, %s592_s11 }
  0x1a   : > { %p601_p13 = scmp.lt.u32.totalorder %s592_s11, %s803_s6 }
  0x1b   : > { %p596_p6 = pneg %p595_p5  ;;  %p600_p10 = por %p599_p7, %p598_p4 }
  0x1d   : > { %p602_p12 = por %p601_p13, %p600_p10 }
  0x1f   : > { %p603_p1 = pnand %p602_p12, %p596_p6 }
  0x21   : > { %606 = shalt.err (!%p603_p1)
}
  0x22   : > { %s607_s28 = scalar_lea.vmem %s805_s8, 1024  ;;  %s706_s29 = smov [#allocation2]  }
  0x23   : > { %p608_p2 = scmp.ne.s32.totalorder %s805_s8, %s607_s28  ;;  %s612_s30 = sshll.u32 %s706_s29, 4  ;;  %s613_s30 = int_to_ptr.vmem [resolvable:$false] %s612_s30 }
  0x24   : > { %s614_s4 = scalar_lea.vmem %s613_s30, 2048  ;;  %p615_p9 = scmp.lt.s32.totalorder %s805_s8, %s613_s30 }
  0x25   : > { %p610_p5 = pnand %p608_p2, %p594_p3  ;;  %p616_p4 = scmp.lt.s32.totalorder %s614_s4, %s607_s28 }
  0x27   : > { %p611_p11 = pneg %p610_p5  ;;  %p617_p7 = por %p616_p4, %p615_p9 }
  0x29   : > { %p618_p10 = pnand %p617_p7, %p611_p11 }
  0x2b   : > { %621 = shalt.err (!%p618_p10)
}
  0x2c   : > { %s707_s5 = smov 256   ;;  %s708_s7 = smov 16  }
  0x2d   : > { %530 = dma.hbm_to_vmem [thread:$0]  (!%p809_p0), %s803_s6, 1024, %s805_s8, %s814_s10, %s707_s5, %s707_s5, %s708_s7  }
  0x2e   : > { %p194_p12 = scmp.lt.s32.totalorder %s704_s17, 3  ;;  %p928_p1 = scmp.ge.s32.totalorder %s704_s17, 1 }
  0x30   : > { %p195_p3 = pnand %p928_p1, %p194_p12 }
  0x31   : > { %s846_s11 = sand.u32 (!%p195_p3), 1, %s688_s13  }
  0x32   : > { %198 = sbr.rel (%p195_p3) target bundleno = 300 (0x12c), region = 32  ;;  %s494_s18 = sshll.u32 (!%p195_p3), %s846_s11, 6 }
  0x33   : > { %s201_s19 = scalar_lea.sflag (!%p195_p3), [#allocation3], %s846_s11  ;;  %s204_s21 = scalar_lea.vmem (!%p195_p3), [#allocation2], %s494_s18 }
  0x39   : > { %675 = dma.done.wait (%p781_p8), %s201_s19, 1024  }
  0x3a   : > { %677 = vsyncadd (%p781_p8), %s201_s19, 4294966272  ;;  %p238_p9 = scmp.lt.s32.totalorder %s696_s15, 1  ;;  %v709_v0 = vmov 0.0   ;;  %v710_v1 = vmov 0   ;;  %v252_v2 = vld [vmem:[%s204_s21 + $0x8] sm:$0xff]  ;;  %v254_v3 = vld [vmem:[%s204_s21 + $0x18] sm:$0xff] }
  0x3b   : > { %342 = vmatprep.mubr.f32.mxu0 %v709_v0  ;;  %348 = vmatprep.mubr.f32.mxu1 %v709_v0  ;;  %v251_v4 = vld [vmem:[%s204_s21] sm:$0xff]  ;;  %v511_v5 = vpack.c.bf16 %v254_v3, %v252_v2  ;;  %v253_v6 = vld [vmem:[%s204_s21 + $0x10] sm:$0xff]  ;;  %v256_v7 = vld [vmem:[%s204_s21 + $0x28] sm:$0xff]  ;;  %vm271_vm0 = vcmask 261120   ;;  %s495_s29 = sshll.u32 %s846_s11, 5  ;;  %s510_s5 = sshll.u32 %s696_s15, 9 }
  0x3c   : > { %s239_s6 = scalar_select %p238_p9, %s696_s15, 1  ;;  %591 = vset.pattern.permute.xlu0 %v710_v1  ;;  %v258_v8 = vld [vmem:[%s204_s21 + $0x38] sm:$0xff]  ;;  %v513_v9 = vpack.c.bf16 %v253_v6, %v251_v4  ;;  %v255_v11 = vld [vmem:[%s204_s21 + $0x20] sm:$0xff]  ;;  %v257_v12 = vld [vmem:[%s204_s21 + $0x30] sm:$0xff] }
  0x3d   : > { %v515_v10 = vpack.c.bf16 %v258_v8, %v256_v7  ;;  %512 = vmatprep.subr.bf16.mxu0 %v511_v5  ;;  %519 = vmatprep.subr.bf16.mxu1 %v511_v5  ;;  %v517_v14 = vpack.c.bf16 %v257_v12, %v255_v11  ;;  %s236_s30 = scalar_lea.vmem [#allocation5], %s495_s29  ;;  %s869_s19 = scalar_lea.hbm %s921_s3, %s510_s5 }
  0x3e   : > { %s508_s8 = sshll.u32 %s239_s6, 4  ;;  %514 = vmatpush1.bf16.msra.mxu0 %v513_v9  ;;  %521 = vmatpush1.bf16.msra.mxu1 %v513_v9  ;;  %s375_s4 = sshll.u32 %s236_s30, 4  ;;  %s864_s4 = int_to_ptr.vmem [resolvable:$true] %s375_s4 }
  0x3f   : > { %s247_s22 = scalar_lea.vmem %s920_s2, %s508_s8  ;;  %516 = vmatprep.subr.bf16.mxu0 %v515_v10  ;;  %520 = vmatprep.subr.bf16.mxu1 %v515_v10  ;;  %s242_s28 = scalar_lea.vmem %s919_s1, %s508_s8 }
  0x40   : > { %v259_v13 = vld [vmem:[%s247_s22] sm:$0xff]  ;;  %v260_v15 = vld [vmem:[%s247_s22 + $0x8] sm:$0xff]  ;;  %s360_s15 = scalar_lea.sflag [#allocation4], %s846_s11  ;;  %s622_s21 = scalar_lea.vmem %s864_s4, 512 }
  0x41   : > { %263 = vperm.xlu0 %591, %v259_v13   ;;  %v249_v16 = vld [vmem:[%s242_s28] sm:$0xff]  ;;  %v250_v17 = vld [vmem:[%s242_s28 + $0x8] sm:$0xff]  ;;  %p623_p8 = scmp.ne.s32.totalorder %s864_s4, %s622_s21  ;;  %p929_p11 = scmp.ne.s32.totalorder %s925_s25, 0 }
  0x42   : > { %518 = vmatpush1.bf16.msra.mxu0 %v517_v14  ;;  %522 = vmatpush1.bf16.msra.mxu1 %v517_v14  ;;  %s711_s6 = smov [#allocation5]  }
  0x43   : > { %p624_p0 = pnand %p623_p8, %p929_p11  ;;  %s626_s8 = sshll.u32 %s711_s6, 4  ;;  %s627_s8 = int_to_ptr.vmem [resolvable:$false] %s626_s8 }
  0x44   : > { %s628_s9 = scalar_lea.vmem %s627_s8, 1024  ;;  %p629_p13 = scmp.lt.s32.totalorder %s864_s4, %s627_s8 }
  0x45   : > { %268 = vperm.xlu0 %591, %v260_v15   ;;  %500 = vmatmul.mubr.msk.f32.vlgmr.msra.gmra.mrb[0].mxu0 %vm271_vm0, %v249_v16  ;;  %p625_p6 = pneg %p624_p0  ;;  %p630_p2 = scmp.lt.s32.totalorder %s628_s9, %s622_s21 }
  0x46   : > { %501 = vmatmul.mubr.msk.f32.vlgmr.msra.gmra.mrb[0].mxu1 %vm271_vm0, %v250_v17 }
  0x47   : > { %p631_p5 = por %p630_p2, %p629_p13 }
  0x49   : > { %p632_p4 = pnand %p631_p5, %p625_p6 }
  0xc0   : > { %v264_v18 = vpop.permute.xlu0 %263 }
  0xc4   : > { %v269_v19 = vpop.permute.xlu0 %268 }
 0x118   : > { %v344_v20 = vpop.f32.mrb[0].mxu0 }
 0x119   : > { %v350_v21 = vpop.f32.mrb[0].mxu1  ;;  %v345_v22 = vadd.f32 %v344_v20, %v264_v18  ;;  %v346_v24 = vpop.f32.mrb[1].mxu0 }
 0x11a   : > { %v351_v23 = vadd.f32 %v350_v21, %v269_v19  ;;  %v352_v25 = vpop.f32.mrb[1].mxu1  ;;  %v347_v26 = vadd.f32 %v346_v24, %v264_v18 }
 0x11b   : > { %v353_v27 = vadd.f32 %v352_v25, %v269_v19  ;;  %355 = vst [vmem:[%s236_s30] sm:$0xff] %v345_v22 }
 0x11c   : > { %357 = vst [vmem:[%s236_s30 + $0x10] sm:$0xff] %v351_v23  ;;  %356 = vst [vmem:[%s236_s30 + $0x8] sm:$0xff] %v347_v26 }
 0x11d   : > { %358 = vst [vmem:[%s236_s30 + $0x18] sm:$0xff] %v353_v27 }
 0x11e   : > { %635 = shalt.err (!%p632_p4)
}
 0x11f   : > { %s636_s10 = scalar_lea.hbm %s869_s19, 512  ;;  %s640_s23 = scalar_lea.hbm %s921_s3, 1024 }
 0x120   : > { %p637_p7 = scmp.ne.s32.totalorder %s869_s19, %s636_s10  ;;  %p641_p1 = scmp.lt.u32.totalorder %s869_s19, %s921_s3 }
 0x121   : > { %p642_p3 = scmp.lt.u32.totalorder %s640_s23, %s636_s10  ;;  %p644_p8 = scmp.lt.u32.totalorder %s636_s10, %s869_s19 }
 0x122   : > { %p638_p10 = pnand %p637_p7, %p929_p11 }
 0x123   : > { %p643_p9 = por %p642_p3, %p641_p1 }
 0x124   : > { %p639_p12 = pneg %p638_p10 }
 0x125   : > { %p645_p0 = por %p644_p8, %p643_p9 }
 0x127   : > { %p646_p6 = pnand %p645_p0, %p639_p12 }
 0x129   : > { %649 = shalt.err (!%p646_p6)
}
 0x12a   : > { %s712_s30 = smov 256   ;;  %s713_s5 = smov 16  }
 0x12b   : > { %525 = dma.vmem_to_hbm [thread:$0]  (%p929_p11), %s864_s4, 512, %s869_s19, %s360_s15, %s712_s30, %s712_s30, %s713_s5  }
 0x12c PF: > { %s390_s7 = sand.u32 1, %s684_s12   ;;  %p930_p13 = scmp.ne.s32.totalorder %s926_s27, 0 }
 0x12d   : > { %p931_p2 = scmp.ge.s32.totalorder %s704_s17, 2  ;;  %s391_s18 = scalar_lea.sflag [#allocation4], %s390_s7 }
 0x12f   : > { %p532_p5 = pnand %p931_p2, %p930_p13 }
 0x131   : > { %679 = dma.done.wait (!%p532_p5), %s391_s18, 512  }
 0x132   : > { %681 = vsyncadd (!%p532_p5), %s391_s18, 4294966784  ;;  %s19_s17 = sadd.s32 1, %s704_s17   ;;  %s932_s12 = smov %s688_s13 }
 0x133   : > { %p16_p4 = scmp.ge.s32.totalorder %s19_s17, 4   ;;  %s933_s13 = smov %s692_s14 }
 0x134   : > { %s934_s14 = smov %s790_s26  ;;  %s935_s15 = smov %s700_s16 }
 0x135   : > { %s936_s16 = smov %s938_s20  ;;  %18 = sbr.rel (!%p16_p4) target bundleno = 6 (0x6), region = 83 }
 0x13c   :  { %396 = vsyncpa [#allocation3], 1 }
 0x13d   :  { %398 = vsyncpa [#allocation3 + $0x1], 1 }
 0x13e   :  { %399 = vsyncpa [#allocation4], 1 }
 0x13f   :  { %401 = vsyncpa [#allocation4 + $0x1], 1 }

</bundles_post_ra>
